<compile_context>
chip_gen: v5e
topology: v5e:2x2
jax: 0.10.0
libtpu: 0.0.40
codegen_flags: <defaults>
</compile_context>

<pallas_src>
import jax
import jax.numpy as jnp
from jax.experimental import pallas as pl
from jax.experimental.pallas import tpu as pltpu

VOCAB_SIZE = 128   # lane-friendly vocab size
B = 2
T = 8

_NEG_BIG = -1e30   # pad-lane logit value (exp underflows to 0, never wins max)


def _round_up(x, m):
    return ((x + m - 1) // m) * m


def _make_bigram_kernel(tn, n_valid, inv_n):
    """tn: row tile; n_valid: true row count N; inv_n: 1/N (baked in)."""

    def kernel(idx_ref, tgt_ref, emb_ref, logits_ref, loss_ref):
        i = pl.program_id(0)
        v_pad = emb_ref.shape[1]

        @pl.when(i == 0)
        def _():
            loss_ref[...] = jnp.zeros_like(loss_ref)

        idx = idx_ref[...]                                              # (TN, 1)
        tgt = tgt_ref[...]                                              # (TN, 1)
        # Single vocab iota reused for both the gather one-hot and target pick.
        vocab_iota = jax.lax.broadcasted_iota(jnp.int32, (tn, v_pad), 1)

        # Embedding lookup as one-hot @ table (MXU hot path).
        onehot = (idx == vocab_iota).astype(emb_ref.dtype)              # (TN, V)
        logits = jnp.dot(onehot, emb_ref[...],
                         preferred_element_type=jnp.float32)            # (TN, V)
        logits_ref[...] = logits

        # Fused cross entropy: max-stabilized log-sum-exp minus target logit.
        m = jnp.max(logits, axis=-1, keepdims=True)                     # (TN, 1)
        lse = m + jnp.log(jnp.sum(jnp.exp(logits - m), axis=-1, keepdims=True))
        tgt_logit = jnp.sum(jnp.where(tgt == vocab_iota, logits, 0.0),
                            axis=-1, keepdims=True)                     # (TN, 1)
        nll = lse - tgt_logit                                           # (TN, 1)

        # Mask rows that were only added to pad N up to a tile multiple.
        row = i * tn + jax.lax.broadcasted_iota(jnp.int32, (tn, 1), 0)
        valid = (row < n_valid).astype(jnp.float32)
        loss_ref[...] = loss_ref[...] + jnp.sum(nll * valid)

        @pl.when(i == pl.num_programs(0) - 1)
        def _():
            loss_ref[...] = loss_ref[...] * inv_n

    return kernel


def bigram_forward(idx, targets, emb_table, *, tile_rows=256):
    """idx, targets: (B, T) int; emb_table: (V, V) float.
    Returns (logits (B*T, V) f32, loss scalar f32), matching
    BigramLanguageModel.forward(idx, targets)."""
    bsz, tlen = idx.shape
    n = bsz * tlen
    v = emb_table.shape[0]

    # Pad vocab to a lane-dense multiple of 128; pad rows/cols get -1e30 so
    # they never contaminate the max / LSE and are sliced off on return.
    v_pad = _round_up(v, 128)
    table = emb_table.astype(jnp.float32)
    if v_pad != v:
        table = jnp.pad(table, ((0, v_pad - v), (0, v_pad - v)),
                        constant_values=_NEG_BIG)

    # Row tile: multiple of 8 (f32 sublane), capped at tile_rows for MXU fill.
    tn = min(tile_rows, _round_up(n, 8))
    n_pad = _round_up(n, tn)
    num_tiles = n_pad // tn

    idx_flat = jnp.pad(idx.reshape(n, 1).astype(jnp.int32),
                       ((0, n_pad - n), (0, 0)))
    tgt_flat = jnp.pad(targets.reshape(n, 1).astype(jnp.int32),
                       ((0, n_pad - n), (0, 0)))

    kernel = _make_bigram_kernel(tn, n, 1.0 / n)

    logits_pad, loss = pl.pallas_call(
        kernel,
        out_shape=(
            jax.ShapeDtypeStruct((n_pad, v_pad), jnp.float32),
            jax.ShapeDtypeStruct((1, 1), jnp.float32),
        ),
        grid_spec=pltpu.PrefetchScalarGridSpec(
            num_scalar_prefetch=0,
            grid=(num_tiles,),
            in_specs=[
                pl.BlockSpec((tn, 1), lambda i: (i, 0)),          # idx stream
                pl.BlockSpec((tn, 1), lambda i: (i, 0)),          # tgt stream
                pl.BlockSpec((v_pad, v_pad), lambda i: (0, 0)),   # table resident
            ],
            out_specs=(
                pl.BlockSpec((tn, v_pad), lambda i: (i, 0)),      # logits stream
                pl.BlockSpec((1, 1), lambda i: (0, 0)),           # loss accumulator
            ),
        ),
        compiler_params=pltpu.CompilerParams(
            # Row axis carries the resident loss accumulator -> "arbitrary".
            # TODO(synk): for v7x megacore, emit per-core loss partials and
            # combine outside so this axis can be marked "parallel".
            dimension_semantics=("arbitrary",),
            vmem_limit_bytes=32 * 1024 * 1024,
        ),
    )(idx_flat, tgt_flat, table)

    return logits_pad[:n, :v], loss[0, 0]


def _reference(idx, targets, emb_table):
    n = idx.size
    lg = emb_table[idx.reshape(-1)]                                     # (N, V)
    lse = jax.scipy.special.logsumexp(lg, axis=-1)
    nll = lse - lg[jnp.arange(n), targets.reshape(-1)]
    return lg, jnp.mean(nll)


if __name__ == "__main__":
    key = jax.random.PRNGKey(0)
    k_emb, k_idx, k_tgt = jax.random.split(key, 3)

    # nn.Embedding default init: N(0, 1).
    emb_table = jax.random.normal(k_emb, (VOCAB_SIZE, VOCAB_SIZE), dtype=jnp.float32)
    idx = jax.random.randint(k_idx, (B, T), 0, VOCAB_SIZE, dtype=jnp.int32)
    targets = jax.random.randint(k_tgt, (B, T), 0, VOCAB_SIZE, dtype=jnp.int32)

    logits, loss = bigram_forward(idx, targets, emb_table)
    jax.block_until_ready((logits, loss))

    ref_logits, ref_loss = _reference(idx, targets, emb_table)
    assert jnp.allclose(logits, ref_logits, atol=1e-5), "logits mismatch"
    assert jnp.allclose(loss, ref_loss, atol=1e-4), "loss mismatch"

    # Extra multi-tile check: exercises the row grid, the cross-tile loss
    # accumulator and the row-padding mask (N = 400 -> two 256-row tiles).
    k2i, k2t = jax.random.split(jax.random.PRNGKey(1))
    idx2 = jax.random.randint(k2i, (4, 100), 0, VOCAB_SIZE, dtype=jnp.int32)
    tgt2 = jax.random.randint(k2t, (4, 100), 0, VOCAB_SIZE, dtype=jnp.int32)
    logits2, loss2 = bigram_forward(idx2, tgt2, emb_table)
    jax.block_until_ready((logits2, loss2))
    ref_logits2, ref_loss2 = _reference(idx2, tgt2, emb_table)
    assert jnp.allclose(logits2, ref_logits2, atol=1e-5), "logits mismatch (tiled)"
    assert jnp.allclose(loss2, ref_loss2, atol=1e-4), "loss mismatch (tiled)"

    print("KERNEL_OK")
</pallas_src>

<mosaic_0001>
module attributes {stable_mosaic.version = 11 : i64} {
  func.func @kernel(%arg0: i32, %arg1: memref<16x1xi32, #tpu.memory_space<vmem>>, %arg2: memref<16x1xi32, #tpu.memory_space<vmem>>, %arg3: memref<128x128xf32, #tpu.memory_space<vmem>>, %arg4: memref<16x128xf32, #tpu.memory_space<vmem>>, %arg5: memref<1x1xf32, #tpu.memory_space<vmem>>) attributes {dimension_semantics = [#tpu.dimension_semantics<arbitrary>], iteration_bounds = array<i64: 1>, scalar_prefetch = 0 : i64, scratch_operands = 0 : i64, tpu.core_type = #tpu.core_type<tc>, window_params = [{transform_indices = @transform_0, window_bounds = array<i64: 16, 1>}, {transform_indices = @transform_1, window_bounds = array<i64: 16, 1>}, {pipeline_mode = #tpu.pipeline_mode<synchronous>, transform_indices = @transform_2, window_bounds = array<i64: 128, 128>}, {transform_indices = @transform_3, window_bounds = array<i64: 16, 128>}, {pipeline_mode = #tpu.pipeline_mode<synchronous>, transform_indices = @transform_4, window_bounds = array<i64: 1, 1>}]} {
    %c0_i32 = arith.constant 0 : i32
    %0 = arith.cmpi eq, %arg0, %c0_i32 : i32
    %1 = arith.extui %0 : i1 to i32
    %c0_i32_0 = arith.constant 0 : i32
    %2 = arith.cmpi ne, %1, %c0_i32_0 : i32
    scf.if %2 {
      %cst_20 = arith.constant 0.000000e+00 : f32
      %49 = vector.broadcast %cst_20 : f32 to vector<1x1xf32>
      %c0_21 = arith.constant 0 : index
      %c0_22 = arith.constant 0 : index
      %50 = vector.load %arg5[%c0_21, %c0_22] : memref<1x1xf32, #tpu.memory_space<vmem>>, vector<1x1xf32>
      tpu.vector_store %arg5[%c0_21, %c0_22], %49 {strides = array<i32>} : memref<1x1xf32, #tpu.memory_space<vmem>>, vector<1x1xf32>,
    } else {
    }
    %c0 = arith.constant 0 : index
    %c0_1 = arith.constant 0 : index
    %3 = vector.load %arg1[%c0, %c0_1] : memref<16x1xi32, #tpu.memory_space<vmem>>, vector<16x1xi32>
    %c0_2 = arith.constant 0 : index
    %c0_3 = arith.constant 0 : index
    %4 = vector.load %arg2[%c0_2, %c0_3] : memref<16x1xi32, #tpu.memory_space<vmem>>, vector<16x1xi32>
    %5 = tpu.iota {dimensions = array<i32: 1>} : vector<16x128xi32>
    %6 = vector.broadcast %3 : vector<16x1xi32> to vector<16x128xi32>
    %7 = arith.cmpi eq, %6, %5 : vector<16x128xi32>
    %8 = arith.extui %7 : vector<16x128xi1> to vector<16x128xi32>
    %9 = arith.sitofp %8 : vector<16x128xi32> to vector<16x128xf32>
    %c0_4 = arith.constant 0 : index
    %c0_5 = arith.constant 0 : index
    %10 = vector.load %arg3[%c0_4, %c0_5] : memref<128x128xf32, #tpu.memory_space<vmem>>, vector<128x128xf32>
    %cst = arith.constant dense<0.000000e+00> : vector<16x128xf32>
    %11 = tpu.matmul %9, %10, %cst {dimension_numbers = #tpu.dot_dimension_numbers<[1], [0], [0], [1], [0, 0, 1, 1], [], []>} : vector<16x128xf32>, vector<128x128xf32>, vector<16x128xf32> -> vector<16x128xf32>
    %c0_6 = arith.constant 0 : index
    %c0_7 = arith.constant 0 : index
    %12 = vector.load %arg4[%c0_6, %c0_7] : memref<16x128xf32, #tpu.memory_space<vmem>>, vector<16x128xf32>
    tpu.vector_store %arg4[%c0_6, %c0_7], %11 {strides = array<i32>} : memref<16x128xf32, #tpu.memory_space<vmem>>, vector<16x128xf32>,
    %cst_8 = arith.constant dense<0xFF800000> : vector<16xf32>
    %13 = vector.multi_reduction <maximumf>, %11, %cst_8 [1] : vector<16x128xf32> to vector<16xf32>
    %14 = vector.shape_cast %13 : vector<16xf32> to vector<16x1xf32>
    %15 = vector.broadcast %14 : vector<16x1xf32> to vector<16x128xf32>
    %16 = arith.subf %11, %15 : vector<16x128xf32>
    %17 = math.exp %16 : vector<16x128xf32>
    %cst_9 = arith.constant dense<0.000000e+00> : vector<16xf32>
    %18 = vector.multi_reduction <add>, %17, %cst_9 [1] : vector<16x128xf32> to vector<16xf32>
    %19 = vector.shape_cast %18 : vector<16xf32> to vector<16x1xf32>
    %20 = math.log %19 : vector<16x1xf32>
    %21 = arith.addf %14, %20 : vector<16x1xf32>
    %22 = vector.broadcast %4 : vector<16x1xi32> to vector<16x128xi32>
    %23 = arith.cmpi eq, %22, %5 : vector<16x128xi32>
    %cst_10 = arith.constant 0.000000e+00 : f32
    %24 = vector.broadcast %cst_10 : f32 to vector<16x128xf32>
    %25 = arith.select %23, %11, %24 : vector<16x128xi1>, vector<16x128xf32>
    %cst_11 = arith.constant dense<0.000000e+00> : vector<16xf32>
    %26 = vector.multi_reduction <add>, %25, %cst_11 [1] : vector<16x128xf32> to vector<16xf32>
    %27 = vector.shape_cast %26 : vector<16xf32> to vector<16x1xf32>
    %28 = arith.subf %21, %27 : vector<16x1xf32>
    %c16_i32 = arith.constant 16 : i32
    %29 = arith.muli %arg0, %c16_i32 : i32
    %30 = tpu.iota {dimensions = array<i32: 0>} : vector<16x1xi32>
    %31 = vector.broadcast %29 : i32 to vector<16x1xi32>
    %32 = arith.addi %31, %30 : vector<16x1xi32>
    %c16_i32_12 = arith.constant 16 : i32
    %33 = vector.broadcast %c16_i32_12 : i32 to vector<16x1xi32>
    %34 = arith.cmpi slt, %32, %33 : vector<16x1xi32>
    %35 = arith.extui %34 : vector<16x1xi1> to vector<16x1xi32>
    %36 = arith.sitofp %35 : vector<16x1xi32> to vector<16x1xf32>
    %c0_13 = arith.constant 0 : index
    %c0_14 = arith.constant 0 : index
    %37 = vector.load %arg5[%c0_13, %c0_14] : memref<1x1xf32, #tpu.memory_space<vmem>>, vector<1x1xf32>
    %38 = arith.mulf %28, %36 : vector<16x1xf32>
    %39 = vector.shape_cast %38 : vector<16x1xf32> to vector<1x16x1xf32>
    %cst_15 = arith.constant dense<0.000000e+00> : vector<1xf32>
    %40 = vector.multi_reduction <add>, %39, %cst_15 [1, 2] : vector<1x16x1xf32> to vector<1xf32>
    %41 = vector.shape_cast %40 : vector<1xf32> to vector<1x1x1xf32>
    %42 = vector.extract %41[0, 0, 0] : f32 from vector<1x1x1xf32>
    %43 = vector.broadcast %42 : f32 to vector<1x1xf32>
    %44 = arith.addf %37, %43 : vector<1x1xf32>
    %c0_16 = arith.constant 0 : index
    %c0_17 = arith.constant 0 : index
    %45 = vector.load %arg5[%c0_16, %c0_17] : memref<1x1xf32, #tpu.memory_space<vmem>>, vector<1x1xf32>
    tpu.vector_store %arg5[%c0_16, %c0_17], %44 {strides = array<i32>} : memref<1x1xf32, #tpu.memory_space<vmem>>, vector<1x1xf32>,
    %c0_i32_18 = arith.constant 0 : i32
    %46 = arith.cmpi eq, %arg0, %c0_i32_18 : i32
    %47 = arith.extui %46 : i1 to i32
    %c0_i32_19 = arith.constant 0 : i32
    %48 = arith.cmpi ne, %47, %c0_i32_19 : i32
    scf.if %48 {
      %c0_20 = arith.constant 0 : index
      %c0_21 = arith.constant 0 : index
      %49 = vector.load %arg5[%c0_20, %c0_21] : memref<1x1xf32, #tpu.memory_space<vmem>>, vector<1x1xf32>
      %cst_22 = arith.constant 6.250000e-02 : f32
      %50 = vector.broadcast %cst_22 : f32 to vector<1x1xf32>
      %51 = arith.mulf %49, %50 : vector<1x1xf32>
      %c0_23 = arith.constant 0 : index
      %c0_24 = arith.constant 0 : index
      %52 = vector.load %arg5[%c0_23, %c0_24] : memref<1x1xf32, #tpu.memory_space<vmem>>, vector<1x1xf32>
      tpu.vector_store %arg5[%c0_23, %c0_24], %51 {strides = array<i32>} : memref<1x1xf32, #tpu.memory_space<vmem>>, vector<1x1xf32>,
    } else {
    }
    return
  }
  func.func @transform_0(%arg0: i32) -> (i32, i32) {
    %c0_i32 = arith.constant 0 : i32
    %c0_i32_0 = arith.constant 0 : i32
    return %arg0, %c0_i32 : i32, i32
  }
  func.func @transform_1(%arg0: i32) -> (i32, i32) {
    %c0_i32 = arith.constant 0 : i32
    %c0_i32_0 = arith.constant 0 : i32
    return %arg0, %c0_i32 : i32, i32
  }
  func.func @transform_2(%arg0: i32) -> (i32, i32) {
    %c0_i32 = arith.constant 0 : i32
    %c0_i32_0 = arith.constant 0 : i32
    %c0_i32_1 = arith.constant 0 : i32
    return %c0_i32, %c0_i32_0 : i32, i32
  }
  func.func @transform_3(%arg0: i32) -> (i32, i32) {
    %c0_i32 = arith.constant 0 : i32
    %c0_i32_0 = arith.constant 0 : i32
    return %arg0, %c0_i32 : i32, i32
  }
  func.func @transform_4(%arg0: i32) -> (i32, i32) {
    %c0_i32 = arith.constant 0 : i32
    %c0_i32_0 = arith.constant 0 : i32
    %c0_i32_1 = arith.constant 0 : i32
    return %c0_i32, %c0_i32_0 : i32, i32
  }
}

</mosaic_0001>

<bundles_post_ra>
// kernel: tpu_custom_call.1
= control target key start
LH: loop header
LB: loop body
LE: loop exit
PB: predicated region body
PF: predicated region fallthrough
CT: control target
= control target key end

     0   :  { %10 = vsyncpa [#allocation3], 0  ;;  %s390_s0 = inlined_call_operand.vmem [shape: s32[16,1], index: 0, kind: input, shape index: {}]   ;;  %s391_s1 = inlined_call_operand.vmem [shape: s32[16,1], index: 1, kind: input, shape index: {}]   ;;  %s392_s2 = inlined_call_operand.hbm [shape: f32[128,128], index: 2, kind: input, shape index: {}]   ;;  %s393_s3 = inlined_call_operand.hbm [shape: f32[16,128], index: 3, kind: output, shape index: {0}]   ;;  %s394_s4 = inlined_call_operand.hbm [shape: f32[1,1], index: 4, kind: output, shape index: {1}]  }
   0x1   :  { %11 = vsyncpa [#allocation4], 0 }
   0x2   :  { %12 = vsyncpa [#allocation7], 0  ;;  %s21_s17 = sshll.u32 %s392_s2, 4  ;;  %s327_s18 = smov [#allocation2]   ;;  %s22_s17 = int_to_ptr.hbm [resolvable:$true] %s21_s17 }
   0x3   :  { %s23_s19 = sshll.u32 %s327_s18, 4  ;;  %s328_s20 = smov 128   ;;  %s24_s19 = int_to_ptr.vmem [resolvable:$true] %s23_s19 }
   0x4   :  { %s329_s21 = smov 8  }
   0x5   :  { %29 = dma.hbm_to_vmem [thread:$0]  %s22_s17, 2048, %s24_s19, [#allocation3], %s328_s20, %s328_s20, %s329_s21  }
   0x6   :  { %321 = dma.done.wait [#allocation3], 2048  }
   0x7   :  { %322 = vsyncadd [#allocation3], 4294965248  ;;  %v330_v0 = vmov 0   ;;  %v40_v1 = vld [vmem:[%s390_s0] sm:$0xff]  ;;  %v73_v2 = vld [vmem:[#allocation2 + $0x78] sm:$0xff]  ;;  %v44_v21 = vlaneseq  ;;  %v331_v24 = vmov 1.0  }
   0x8   :  { %239 = vset.pattern.permute.xlu0 %v330_v0  ;;  %240 = vset.pattern.permute.xlu2 %v330_v0  ;;  %v72_v3 = vld [vmem:[#allocation2 + $0x70] sm:$0xff]  ;;  %v71_v4 = vld [vmem:[#allocation2 + $0x68] sm:$0xff]  ;;  %v70_v5 = vld [vmem:[#allocation2 + $0x60] sm:$0xff]  ;;  %vm151_vm4 = vcmask 7168   ;;  %s180_s29 = sshll.u32 %s393_s3, 4  ;;  %s332_s30 = smov [#allocation5]   ;;  %s181_s29 = int_to_ptr.hbm [resolvable:$true] %s180_s29 }
   0x9   :  { %47 = vperm.xlu0 %239, %v40_v1   ;;  %74 = vmatpush.msra.mxu0 %v73_v2  ;;  %v41_v6 = vld [vmem:[%s390_s0 + $0x8] sm:$0xff]  ;;  %v69_v7 = vld [vmem:[#allocation2 + $0x58] sm:$0xff]  ;;  %v68_v8 = vld [vmem:[#allocation2 + $0x50] sm:$0xff]  ;;  %v45_v22 = vand.u32 127, %v44_v21  ;;  %s178_s5 = sshll.u32 %s332_s30, 4  ;;  %vm38_vm5 = vcmask 0   ;;  %s179_s5 = int_to_ptr.vmem [resolvable:$true] %s178_s5 }
   0xa   :  { %213 = vmatpush.msra.mxu1 %v73_v2  ;;  %v67_v9 = vld [vmem:[#allocation2 + $0x48] sm:$0xff]  ;;  %v66_v10 = vld [vmem:[#allocation2 + $0x40] sm:$0xff]  ;;  %v65_v11 = vld [vmem:[#allocation2 + $0x38] sm:$0xff]  ;;  %v333_v55 = vmov 0.0   ;;  %s334_s6 = smov [#allocation6]   ;;  %s194_s10 = sshll.u32 %s394_s4, 4  ;;  %s195_s10 = int_to_ptr.hbm [resolvable:$true] %s194_s10 }
   0xb   :  { %75 = vmatpush.msra.mxu0 %v72_v3  ;;  %v64_v12 = vld [vmem:[#allocation2 + $0x30] sm:$0xff]  ;;  %v63_v13 = vld [vmem:[#allocation2 + $0x28] sm:$0xff]  ;;  %v62_v14 = vld [vmem:[#allocation2 + $0x20] sm:$0xff]  ;;  %39 = vst.msk [vmem:[#allocation6] sm:$0x1] %vm38_vm5, %v333_v55  ;;  %s192_s7 = sshll.u32 %s334_s6, 4  ;;  %s193_s7 = int_to_ptr.vmem [resolvable:$true] %s192_s7 }
   0xc   :  { %214 = vmatpush.msra.mxu1 %v72_v3  ;;  %v61_v15 = vld [vmem:[#allocation2 + $0x18] sm:$0xff]  ;;  %v60_v16 = vld [vmem:[#allocation2 + $0x10] sm:$0xff]  ;;  %v59_v17 = vld [vmem:[#allocation2 + $0x8] sm:$0xff] }
   0xd   :  { %76 = vmatpush.msra.mxu0 %v71_v4  ;;  %v58_v18 = vld [vmem:[#allocation2] sm:$0xff]  ;;  %v43_v20 = vld [vmem:[%s391_s1 + $0x8] sm:$0xff] }
   0xe   :  { %215 = vmatpush.msra.mxu1 %v71_v4  ;;  %v42_v19 = vld [vmem:[%s391_s1] sm:$0xff] }
   0xf   :  { %77 = vmatpush.msra.mxu0 %v70_v5  ;;  %120 = vperm.xlu2 %240, %v42_v19  }
  0x10   :  { %216 = vmatpush.msra.mxu1 %v70_v5 }
  0x11   :  { %50 = vperm.xlu0 %239, %v41_v6   ;;  %78 = vmatpush.msra.mxu0 %v69_v7 }
  0x12   :  { %217 = vmatpush.msra.mxu1 %v69_v7  ;;  %v148_v63 = vld [vmem:[#allocation6] sm:$0x1] }
  0x13   :  { %79 = vmatpush.msra.mxu0 %v68_v8 }
  0x14   :  { %218 = vmatpush.msra.mxu1 %v68_v8 }
  0x15   :  { %80 = vmatpush.msra.mxu0 %v67_v9 }
  0x16   :  { %219 = vmatpush.msra.mxu1 %v67_v9 }
  0x17   :  { %81 = vmatpush.msra.mxu0 %v66_v10  ;;  %123 = vperm.xlu2 %240, %v43_v20  }
  0x18   :  { %220 = vmatpush.msra.mxu1 %v66_v10 }
  0x19   :  { %82 = vmatpush.msra.mxu0 %v65_v11 }
  0x1a   :  { %221 = vmatpush.msra.mxu1 %v65_v11 }
  0x1b   :  { %83 = vmatpush.msra.mxu0 %v64_v12 }
  0x1c   :  { %222 = vmatpush.msra.mxu1 %v64_v12 }
  0x1d   :  { %84 = vmatpush.msra.mxu0 %v63_v13 }
  0x1e   :  { %223 = vmatpush.msra.mxu1 %v63_v13 }
  0x1f   :  { %85 = vmatpush.msra.mxu0 %v62_v14 }
  0x20   :  { %224 = vmatpush.msra.mxu1 %v62_v14 }
  0x21   :  { %86 = vmatpush.msra.mxu0 %v61_v15 }
  0x22   :  { %225 = vmatpush.msra.mxu1 %v61_v15 }
  0x23   :  { %87 = vmatpush.msra.mxu0 %v60_v16 }
  0x24   :  { %226 = vmatpush.msra.mxu1 %v60_v16 }
  0x25   :  { %88 = vmatpush.msra.mxu0 %v59_v17 }
  0x26   :  { %227 = vmatpush.msra.mxu1 %v59_v17 }
  0x27   :  { %89 = vmatpush.msra.mxu0 %v58_v18 }
  0x28   :  { %228 = vmatpush.msra.mxu1 %v58_v18 }
  0x69   :  { %v121_v26 = vpop.permute.xlu2 %120 }
  0x6a   :  { %vm125_vm2 = vcmp.eq.s32.totalorder %v121_v26, %v45_v22 }
  0x71   :  { %v124_v38 = vpop.permute.xlu2 %123 }
  0x72   :  { %vm126_vm3 = vcmp.eq.s32.totalorder %v124_v38, %v45_v22 }
  0x7b   :  { %v48_v23 = vpop.permute.xlu0 %47 }
  0x7c   :  { %vm52_vm0 = vcmp.eq.s32.totalorder %v48_v23, %v45_v22 }
  0x7d   :  { %211 = vmatmul.msk.f32.vlgmr.msra.gmra.mxu0 %vm52_vm0, %v331_v24 }
  0x83   :  { %v51_v25 = vpop.permute.xlu0 %50 }
  0x84   :  { %vm53_vm1 = vcmp.eq.s32.totalorder %v51_v25, %v45_v22 }
  0x85   :  { %212 = vmatmul.msk.f32.vlgmr.msra.gmra.mxu1 %vm53_vm1, %v331_v24 }
  0xfa   :  { %v91_v27 = vpop.f32.mrf.mxu0 }
  0xfb   :  { %97 = vst [vmem:[#allocation5] sm:$0xff] %v91_v27  ;;  %99 = vmax.xlane.f32.xlu1 %v91_v27  ;;  %v127_v28 = vsel %vm125_vm2, %v91_v27, 0.0 }
  0xfc   :  { %129 = vadd.xlane.f32.xlu2 %v127_v28 }
 0x102   :  { %v94_v29 = vpop.f32.mrf.mxu1 }
 0x103   :  { %98 = vst [vmem:[#allocation5 + $0x8] sm:$0xff] %v94_v29  ;;  %101 = vmax.xlane.f32.xlu1 %v94_v29  ;;  %v128_v39 = vsel %vm126_vm3, %v94_v29, 0.0 }
 0x104   :  { %186 = dma.vmem_to_hbm [thread:$0]  %s179_s5, 256, %s181_s29, [#allocation4], %s328_s20, %s328_s20, %s329_s21  }
 0x16e   :  { %v100_v30 = vpop.xlane.xlu1 %99 }
 0x16f   :  { %v103_v31 = vsub.f32 %v91_v27, %v100_v30  ;;  %v130_v47 = vpop.xlane.xlu2 %129 }
 0x171   :  { %v105_v32 = vmul.f32 1.442695, %v103_v31 }
 0x173   :  { %241 = vpow2.f32 %v105_v32 }
 0x176   :  { %v102_v33 = vpop.xlane.xlu1 %101 }
 0x177   :  { %v104_v34 = vsub.f32 %v94_v29, %v102_v33 }
 0x179   :  { %v242_v35 = vpop.eup %241  ;;  %v107_v36 = vmul.f32 1.442695, %v104_v34 }
 0x17a   :  { %109 = vadd.xlane.f32.xlu0 %v242_v35 }
 0x17b   :  { %243 = vpow2.f32 %v107_v36 }
 0x181   :  { %v244_v37 = vpop.eup %243 }
 0x182   :  { %111 = vadd.xlane.f32.xlu1 %v244_v37 }
 0x18a   :  { %131 = vadd.xlane.f32.xlu1 %v128_v39 }
 0x1ed   :  { %v110_v40 = vpop.xlane.xlu0 %109 }
 0x1ee   :  { %245 = vlog2.f32 %v110_v40 }
 0x1f4   :  { %v246_v41 = vpop.eup %245 }
 0x1f5   :  { %v112_v42 = vpop.xlane.xlu1 %111  ;;  %v114_v43 = vmul.f32 0.6931472, %v246_v41 }
 0x1f6   :  { %247 = vlog2.f32 %v112_v42 }
 0x1f7   :  { %v117_v44 = vadd.f32 %v114_v43, %v100_v30 }
 0x1f9   :  { %v133_v49 = vsub.f32 %v117_v44, %v130_v47 }
 0x1fb   :  { %v152_v52 = vsel %vm151_vm4, %v133_v49, 0.0 }
 0x1fc   :  { %v248_v45 = vpop.eup %247 }
 0x1fd   :  { %v116_v46 = vmul.f32 0.6931472, %v248_v45  ;;  %v132_v50 = vpop.xlane.xlu1 %131 }
 0x1ff   :  { %v118_v48 = vadd.f32 %v116_v46, %v102_v33 }
 0x201   :  { %v134_v51 = vsub.f32 %v118_v48, %v132_v50 }
 0x203   :  { %v153_v53 = vsel %vm151_vm4, %v134_v51, 0.0 }
 0x204   :  { %v154_v54 = vadd.f32 %v153_v53, %v152_v52 }
 0x206   :  { %155 = vadd.xlane.f32.xlu1 %v154_v54 }
 0x279   :  { %v156_v56 = vpop.xlane.xlu1 %155 }
 0x27a   :  { %v157_v57 = vrot.slane %v156_v56, 4 }
 0x27c   :  { %v158_v58 = vadd.f32 %v157_v57, %v156_v56 }
 0x27e   :  { %v159_v59 = vrot.slane %v158_v58, 2 }
 0x280   :  { %v160_v60 = vadd.f32 %v159_v59, %v158_v58 }
 0x282   :  { %v161_v61 = vrot.slane %v160_v60, 1 }
 0x284   :  { %v162_v62 = vadd.f32 %v161_v61, %v160_v60 }
 0x286   :  { %229 = vpush %v162_v62 }
 0x2b7   :  { %s230_s3 = spop %229 }
 0x2b8   :  { %v164_v0 = vstv %s230_s3 }
 0x2b9   :  { %v165_v1 = vadd.f32 %v164_v0, %v148_v63 }
 0x2bb   :  { %167 = vst.msk [vmem:[#allocation6] sm:$0x1] %vm38_vm5, %v165_v1 }
 0x2c2   :  { %v171_v2 = vld [vmem:[#allocation6] sm:$0x1] }
 0x2c3   :  { %v172_v3 = vmul.f32 0.0625, %v171_v2 }
 0x2c5   :  { %173 = vst.msk [vmem:[#allocation6] sm:$0x1] %vm38_vm5, %v172_v3 }
 0x2c6   :  { %197 = dma.vmem_to_hbm [thread:$0]  %s193_s7, 16, %s195_s10, [#allocation7]  }
 0x2c7   :  { %323 = dma.done.wait [#allocation4], 256  }
 0x2c8   :  { %324 = vsyncadd [#allocation4], 4294967040 }
 0x2c9   :  { %325 = dma.done.wait [#allocation7], 16  }
 0x2ca   :  { %326 = vsyncadd [#allocation7], 4294967280 }
 0x2cb   :  { %206 = vsyncpa [#allocation3], 1 }
 0x2cc   :  { %207 = vsyncpa [#allocation4], 1 }
 0x2cd   :  { %208 = vsyncpa [#allocation7], 1 }

</bundles_post_ra>
